<compile_context>
chip_gen: v7x
topology: tpu7x:2x2x1
jax: 0.10.0
libtpu: 0.0.40
codegen_flags: <defaults>
</compile_context>

<pallas_src>
import jax
import jax.numpy as jnp
from jax.experimental import pallas as pl
from jax.experimental.pallas import tpu as pltpu

# Module hyper-parameters (from __init__ defaults).
LAMBDA1 = 8.759
GAMMA1 = 2.148
LAMBDA2 = 0.1494
GAMMA2 = -2.067
EPSILON = 1e-06  # defined in the module but unused in forward(); kept for parity

_LANES = 128
_TARGET_TILE_ROWS = 2048  # 2048 rows x 128 lanes x 4 B = 1 MiB f32 per block


def _round_up(n: int, m: int) -> int:
    return ((n + m - 1) // m) * m


def _cdiv(a: int, b: int) -> int:
    return -(-a // b)


def _mulaw_kernel(mu_ref, inv_log_denom_ref, x_ref, o_ref):
    """Elementwise mu-law compression hot path.

    mu_ref, inv_log_denom_ref : SMEM f32[B]                (per-batch scalars)
    x_ref, o_ref              : VMEM f32[1, tile_rows, 128] (lane-dense tile)
    """
    b = pl.program_id(0)
    mu = mu_ref[b]
    inv_denom = inv_log_denom_ref[b]
    # torch.log1p(mu * x) / torch.log(1 + mu)  ==  log1p(mu * x) * (1/log1p(mu))
    o_ref[...] = jnp.log1p(mu * x_ref[...]) * inv_denom


def adaptive_mulaw_compression(hdr_image: jax.Array) -> jax.Array:
    """Forward pass of AdaptiveMuLawCompression. hdr_image: f32[B, C, H, W]."""
    B, C, H, W = hdr_image.shape
    x = hdr_image.astype(jnp.float32)
    flat = x.reshape(B, -1)
    P = flat.shape[1]

    # --- glue: adaptive mu from the per-image median (B scalars) -------------
    # torch.median(dim=...) returns the LOWER of the two middle values for
    # even n, hence the sort + index (not jnp.median, which averages).
    # TODO(synk): the O(N log N) sort-based median stays in plain JAX (no clean
    # Pallas/Mosaic sort primitive); a streaming histogram-median Pallas
    # reduction would remove this pass, which dominates end-to-end time.
    sorted_vals = jnp.sort(flat, axis=1)
    i_hdr = sorted_vals[:, (P - 1) // 2]
    # NOTE: i_hdr ** GAMMA2 (GAMMA2 < 0) is inf/nan if the median is <= 0 --
    # same hazard as the PyTorch original; kept for parity.
    mu = (LAMBDA1 * i_hdr ** GAMMA1 + LAMBDA2 * i_hdr ** GAMMA2).astype(jnp.float32)
    inv_log_denom = (1.0 / jnp.log1p(mu)).astype(jnp.float32)

    # --- lane-dense layout: (B, rows, 128), tiled along rows -----------------
    rows = _cdiv(P, _LANES)
    rows8 = _round_up(rows, 8)
    n_tiles = max(1, _cdiv(rows8, _TARGET_TILE_ROWS))
    tile_rows = _round_up(_cdiv(rows8, n_tiles), 8)   # multiple of 8, ~target size
    rows_padded = n_tiles * tile_rows
    P_padded = rows_padded * _LANES
    if P_padded != P:
        # zero-pad: log1p(mu * 0) * inv = 0, so padding is inert.
        flat = jnp.pad(flat, ((0, 0), (0, P_padded - P)))
    x3 = flat.reshape(B, rows_padded, _LANES)

    cost = pl.CostEstimate(
        flops=2 * B * P_padded,             # mul + mul per element
        transcendentals=B * P_padded,       # one log1p per element
        bytes_accessed=8 * B * P_padded,    # f32 read + f32 write
    )

    # --- Pallas kernel: elementwise compression over all pixels --------------
    # (input_output_aliases={2: 0} could be added when the caller donates the
    #  input; left off so the wrapper has no side effects on its argument.)
    out3 = pl.pallas_call(
        _mulaw_kernel,
        out_shape=jax.ShapeDtypeStruct((B, rows_padded, _LANES), jnp.float32),
        grid=(B, n_tiles),
        in_specs=[
            pl.BlockSpec(memory_space=pltpu.MemorySpace.SMEM),  # mu[B]
            pl.BlockSpec(memory_space=pltpu.MemorySpace.SMEM),  # 1/log1p(mu)[B]
            pl.BlockSpec((1, tile_rows, _LANES), lambda b, t: (b, t, 0)),
        ],
        out_specs=pl.BlockSpec((1, tile_rows, _LANES), lambda b, t: (b, t, 0)),
        compiler_params=pltpu.CompilerParams(
            dimension_semantics=("parallel", "parallel")),
        cost_estimate=cost,
    )(mu, inv_log_denom, x3)

    return out3.reshape(B, P_padded)[:, :P].reshape(B, C, H, W)


def _reference(hdr_image: jax.Array) -> jax.Array:
    """Pure-JAX reference mirroring the PyTorch forward."""
    B = hdr_image.shape[0]
    flat = hdr_image.reshape(B, -1)
    n = flat.shape[1]
    i_hdr = jnp.sort(flat, axis=1)[:, (n - 1) // 2]
    mu = LAMBDA1 * i_hdr ** GAMMA1 + LAMBDA2 * i_hdr ** GAMMA2
    mu_b = mu[:, None, None, None]
    return jnp.log1p(mu_b * hdr_image) / jnp.log1p(mu_b)


if __name__ == "__main__":
    key = jax.random.PRNGKey(0)
    B, C, H, W = 2, 4, 16, 16
    # HDR-ish positive values
    x = jax.random.uniform(key, (B, C, H, W), dtype=jnp.float32,
                           minval=0.01, maxval=4.0)

    y = adaptive_mulaw_compression(x)
    jax.block_until_ready(y)

    y_ref = _reference(x)
    assert y.shape == (B, C, H, W) and y.dtype == jnp.float32
    assert jnp.allclose(y, y_ref, rtol=1e-5, atol=1e-5), "mismatch vs reference"

    print("KERNEL_OK")
</pallas_src>

<mosaic_0001>
module attributes {stable_mosaic.version = 11 : i64} {
  func.func @_mulaw_kernel(%arg0: i32, %arg1: i32, %arg2: memref<2xf32, #tpu.memory_space<smem>>, %arg3: memref<2xf32, #tpu.memory_space<smem>>, %arg4: memref<1x8x128xf32, #tpu.memory_space<vmem>>, %arg5: memref<1x8x128xf32, #tpu.memory_space<vmem>>) attributes {dimension_semantics = [#tpu.dimension_semantics<parallel>, #tpu.dimension_semantics<parallel>], iteration_bounds = array<i64: 2, 1>, scalar_prefetch = 0 : i64, scratch_operands = 0 : i64, tpu.core_type = #tpu.core_type<tc>, window_params = [{transform_indices = @transform_0, window_bounds = array<i64: 2>}, {transform_indices = @transform_1, window_bounds = array<i64: 2>}, {transform_indices = @transform_2, window_bounds = array<i64: 1, 8, 128>}, {transform_indices = @transform_3, window_bounds = array<i64: 1, 8, 128>}]} {
    %0 = arith.index_cast %arg0 : i32 to index
    %1 = memref.load %arg2[%0] : memref<2xf32, #tpu.memory_space<smem>>
    %2 = arith.index_cast %arg0 : i32 to index
    %3 = memref.load %arg3[%2] : memref<2xf32, #tpu.memory_space<smem>>
    %c0 = arith.constant 0 : index
    %c0_0 = arith.constant 0 : index
    %c0_1 = arith.constant 0 : index
    %4 = vector.load %arg4[%c0, %c0_0, %c0_1] : memref<1x8x128xf32, #tpu.memory_space<vmem>>, vector<1x8x128xf32>
    %5 = vector.broadcast %1 : f32 to vector<1x8x128xf32>
    %6 = arith.mulf %5, %4 : vector<1x8x128xf32>
    %7 = math.log1p %6 : vector<1x8x128xf32>
    %8 = vector.broadcast %3 : f32 to vector<1x8x128xf32>
    %9 = arith.mulf %7, %8 : vector<1x8x128xf32>
    %c0_2 = arith.constant 0 : index
    %c0_3 = arith.constant 0 : index
    %c0_4 = arith.constant 0 : index
    %10 = vector.load %arg5[%c0_2, %c0_3, %c0_4] : memref<1x8x128xf32, #tpu.memory_space<vmem>>, vector<1x8x128xf32>
    tpu.vector_store %arg5[%c0_2, %c0_3, %c0_4], %9 {strides = array<i32>} : memref<1x8x128xf32, #tpu.memory_space<vmem>>, vector<1x8x128xf32>,
    return
  }
  func.func @transform_0(%arg0: i32, %arg1: i32) -> i32 {
    %c0_i32 = arith.constant 0 : i32
    %c0_i32_0 = arith.constant 0 : i32
    return %c0_i32 : i32
  }
  func.func @transform_1(%arg0: i32, %arg1: i32) -> i32 {
    %c0_i32 = arith.constant 0 : i32
    %c0_i32_0 = arith.constant 0 : i32
    return %c0_i32 : i32
  }
  func.func @transform_2(%arg0: i32, %arg1: i32) -> (i32, i32, i32) {
    %c0_i32 = arith.constant 0 : i32
    %c0_i32_0 = arith.constant 0 : i32
    return %arg0, %arg1, %c0_i32 : i32, i32, i32
  }
  func.func @transform_3(%arg0: i32, %arg1: i32) -> (i32, i32, i32) {
    %c0_i32 = arith.constant 0 : i32
    %c0_i32_0 = arith.constant 0 : i32
    return %arg0, %arg1, %c0_i32 : i32, i32, i32
  }
}

</mosaic_0001>

<bundles_post_ra>
// kernel: tpu_custom_call.1
= control target key start
LH: loop header
LB: loop body
LE: loop exit
PB: predicated region body
PF: predicated region fallthrough
CT: control target
= control target key end

     0   :  { %8 = vsyncpa [#allocation5], 0  ;;  %s865_s0 = inlined_call_operand.hbm [shape: f32[2], index: 0, kind: input, shape index: {}]   ;;  %s866_s1 = inlined_call_operand.vmem [shape: f32[2], index: 1, kind: input, shape index: {}]   ;;  %s867_s2 = inlined_call_operand.hbm [shape: f32[2,8,128], index: 2, kind: input, shape index: {}]   ;;  %s868_s3 = inlined_call_operand.hbm [shape: f32[2,8,128], index: 3, kind: output, shape index: {}]  }
   0x1   :  { %9 = vsyncpa [#allocation6], 0 }
   0x2   :  { %10 = vsyncpa [#allocation3], 0 }
   0x3   :  { %12 = vsyncpa [#allocation3 + $0x1], 0 }
   0x4   :  { %13 = vsyncpa [#allocation4], 0 }
   0x5   :  { %15 = vsyncpa [#allocation4 + $0x1], 0  ;;  %s640_s12 = smov 0   ;;  %s642_s13 = smov 0  }
   0x6   :  { %s644_s14 = smov 0   ;;  %s646_s15 = smov 0  }
   0x7   :  { %s648_s16 = smov 0   ;;  %s650_s17 = smov 0  }
   0x8 LB: > { %s364_s18 = sadd.s32 4294967295, %s614_s17   ;;  %s365_s19 = sadd.s32 4294967294, %s614_s17   ;;  %s614_s17 = sphi %s650_s17, %s21_s17   ;;  %s610_s16 = sphi %s648_s16, %s891_s16   ;;  %s606_s15 = sphi %s646_s15, %s890_s15   ;;  %s602_s14 = sphi %s644_s14, %s889_s14   ;;  %s598_s13 = sphi %s642_s13, %s888_s13   ;;  %s594_s12 = sphi %s640_s12, %s887_s12  }
   0x9   : > { %p97_p0 = scmp.ne.s32.totalorder %s598_s13, %s594_s12  ;;  %p674_p1 = scmp.eq.s32.totalorder %s364_s18, 0 }
   0xa   : > { %p678_p2 = scmp.eq.s32.totalorder %s364_s18, 1  ;;  %p129_p3 = scmp.eq.s32.totalorder %s365_s19, 1 }
   0xb   : > { %s873_s20 = scalar_select %p674_p1, 1, 0 }
   0xc   : > { %p684_p4 = por %p674_p1, %p97_p0  ;;  %p366_p5 = scmp.ge.s32.totalorder %s614_s17, 1 }
   0xd   : > { %p689_p6 = por %p129_p3, %p97_p0  ;;  %p136_p7 = scmp.lt.s32.totalorder %s614_s17, 3 }
   0xe   : > { %s875_s22 = scalar_select %p684_p4, 1, 0 }
   0xf   : > { %s876_s23 = scalar_select %p689_p6, 1, 0 }
  0x10   : > { %p694_p8 = pnand %p366_p5, %p136_p7  ;;  %s158_s27 = sshll.u32 %s866_s1, 4  ;;  %s159_s27 = int_to_ptr.vmem [resolvable:$true] %s158_s27 }
  0x11   : > { %s33_s29 = sadd.s32 1, %s610_s16  ;;  %s466_s6 = scalar_lea.hbm %s865_s0, 16 }
  0x12   : > { %s877_s24 = scalar_select %p694_p8, 1, 0 }
  0x13   : > { %p393_p10 = pneg %p694_p8  ;;  %p711_p12 = scmp.ge.s32.totalorder %s33_s29, 2 }
  0x14   : > { %p467_p13 = scmp.ne.s32.totalorder %s865_s0, %s466_s6  ;;  %p473_p7 = scmp.lt.u32.totalorder %s466_s6, %s865_s0 }
  0x15   : > { %p706_p11 = pnand %p393_p10, %p674_p1 }
  0x17   : > { %p468_p0 = pneg %p706_p11 }
  0x19   : > { %p469_p3 = pnand %p468_p0, %p467_p13 }
  0x1b   : > { %p470_p5 = pneg %p469_p3 }
  0x1d   : > { %p475_p10 = pnand %p473_p7, %p470_p5 }
  0x1f   : > { %478 = shalt.err (!%p475_p10)
}
  0x20   : > { %s616_s11 = smov [#allocation2]   ;;  %s479_s25 = scalar_lea.vmem %s159_s27, 16 }
  0x21   : > { %396 = dma.hbm_to_smem (!%p706_p11), %s865_s0, 16, %s616_s11, [#allocation5]  }
  0x22   : > { %p480_p9 = scmp.ne.s32.totalorder %s159_s27, %s479_s25  ;;  %p487_p1 = scmp.lt.s32.totalorder %s159_s27, %s159_s27 }
  0x23   : > { %p488_p13 = scmp.lt.s32.totalorder %s479_s25, %s479_s25 }
  0x24   : > { %p482_p6 = pnand %p480_p9, %p468_p0 }
  0x25   : > { %p489_p3 = por %p488_p13, %p487_p1 }
  0x26   : > { %p483_p4 = pneg %p482_p6 }
  0x28   : > { %p490_p8 = pnand %p489_p3, %p483_p4 }
  0x2a   : > { %493 = shalt.err (!%p490_p8)
}
  0x2b   : > { %s617_s26 = smov [#allocation7]   ;;  %s893_s29 = smov (%p711_p12, %s33_s29), 0 }
  0x2c   : > { %399 = dma.vmem_to_smem (!%p706_p11), %s159_s27, 16, %s617_s26, [#allocation6]  }
  0x2d   : > { %s84_s4 = sadd.s32 1, %s602_s14  ;;  %p91_p1 = scmp.ne.s32.totalorder %s602_s14, %s598_s13 }
  0x2e   : > { %s79_s5 = ssub.s32 %s610_s16, %s893_s29  ;;  %p92_p4 = scmp.eq.s32.totalorder %s614_s17, 0 }
  0x2f   : > { %p82_p6 = scmp.eq.s32.totalorder %s79_s5, 0  ;;  %p745_p8 = por %p678_p2, %p91_p1 }
  0x30   : > { %p93_p9 = por %p92_p4, %p91_p1  ;;  %p410_p0 = scmp.lt.s32.totalorder %s614_s17, 2 }
  0x31   : > { %s751_s6 = scalar_select %p82_p6, %s602_s14, %s84_s4  }
  0x32   : > { %s169_s7 = sand.u32 1, %s602_s14   ;;  %s371_s27 = sshll.u32 %s610_s16, 7 }
  0x33   : > { %s370_s30 = sshll.u32 %s169_s7, 3  ;;  %s758_s10 = scalar_lea.hbm %s867_s2, %s371_s27 }
  0x34   : > { %s173_s21 = scalar_lea.vmem [#allocation8], %s370_s30  ;;  %p760_p2 = pnand %p410_p0, %p93_p9 }
  0x35   : > { %s181_s11 = sshll.u32 %s173_s21, 4  ;;  %s170_s19 = scalar_lea.sflag [#allocation3], %s169_s7  ;;  %s764_s11 = int_to_ptr.vmem [resolvable:$true] %s181_s11 }
  0x36   : > { %s494_s25 = scalar_lea.hbm %s758_s10, 128  ;;  %p496_p12 = pneg %p760_p2 }
  0x37   : > { %p495_p11 = scmp.ne.s32.totalorder %s758_s10, %s494_s25  ;;  %s499_s5 = scalar_lea.hbm %s867_s2, 256 }
  0x38   : > { %p500_p10 = scmp.lt.u32.totalorder %s758_s10, %s867_s2  ;;  %p501_p13 = scmp.lt.u32.totalorder %s499_s5, %s494_s25 }
  0x39   : > { %p497_p5 = pnand %p496_p12, %p495_p11  ;;  %p503_p1 = scmp.lt.u32.totalorder %s494_s25, %s758_s10 }
  0x3a   : > { %p502_p3 = por %p501_p13, %p500_p10 }
  0x3b   : > { %p498_p7 = pneg %p497_p5 }
  0x3c   : > { %p504_p4 = por %p503_p1, %p502_p3 }
  0x3e   : > { %p505_p6 = pnand %p504_p4, %p498_p7 }
  0x40   : > { %508 = shalt.err (!%p505_p6)
}
  0x41   : > { %s509_s7 = scalar_lea.vmem %s764_s11, 128  ;;  %s618_s8 = smov [#allocation8]  }
  0x42   : > { %p510_p9 = scmp.ne.s32.totalorder %s764_s11, %s509_s7  ;;  %s514_s9 = sshll.u32 %s618_s8, 4  ;;  %s515_s9 = int_to_ptr.vmem [resolvable:$false] %s514_s9 }
  0x43   : > { %s516_s21 = scalar_lea.vmem %s515_s9, 256  ;;  %p517_p5 = scmp.lt.s32.totalorder %s764_s11, %s515_s9 }
  0x44   : > { %p512_p0 = pnand %p510_p9, %p496_p12  ;;  %p518_p10 = scmp.lt.s32.totalorder %s516_s21, %s509_s7 }
  0x46   : > { %p513_p11 = pneg %p512_p0  ;;  %p519_p13 = por %p518_p10, %p517_p5 }
  0x48   : > { %p520_p3 = pnand %p519_p13, %p513_p11 }
  0x4a   : > { %523 = shalt.err (!%p520_p3)
}
  0x4b   : > { %403 = dma.hbm_to_vmem [thread:$0]  (!%p760_p2), %s758_s10, 128, %s764_s11, %s170_s19  }
  0x4c   : > { %p882_p7 = scmp.ne.s32.totalorder %s877_s24, 0 }
  0x4d   : > { %p883_p12 = scmp.ne.s32.totalorder (!%p882_p7), %s873_s20, 0 }
  0x4e   : > { %190 = sbr.rel (%p882_p7) target bundleno = 135 (0x87), region = 32 }
  0x55   : > { %577 = dma.done.wait (%p883_p12), [#allocation5], 16  }
  0x56   : > { %579 = vsyncadd (%p883_p12), [#allocation5], 4294967280 }
  0x57   : > { %581 = dma.done.wait (%p883_p12), [#allocation6], 16  }
  0x58   : > { %583 = vsyncadd (%p883_p12), [#allocation6], 4294967280  ;;  %s802_s18 = sand.u32 1, %s598_s13   ;;  %p884_p2 = scmp.ne.s32.totalorder %s875_s22, 0 }
  0x59   : > { %s375_s24 = sshll.u32 %s802_s18, 3  ;;  %s201_s10 = scalar_lea.sflag [#allocation3], %s802_s18 }
  0x5a   : > { %s204_s11 = scalar_lea.vmem [#allocation8], %s375_s24 }
  0x5b   : > { %585 = dma.done.wait (%p884_p2), %s201_s10, 128  }
  0x5c   : > { %587 = vsyncadd (%p884_p2), %s201_s10, 4294967168 }
  0x5d   : > { %209 = sfence }
  0x5e   : > { %s228_s19 = sld [smem:[#allocation2 + %s606_s15]]  ;;  %v230_v0 = vld [vmem:[%s204_s11] sm:$0xff]  ;;  %s227_s22 = scalar_lea.vmem [#allocation9], %s375_s24 }
  0x5f   : > { %s229_s20 = sld [smem:[#allocation7 + %s606_s15]]  ;;  %s260_s25 = sshll.u32 %s227_s22, 4  ;;  %s813_s25 = int_to_ptr.vmem [resolvable:$true] %s260_s25 }
  0x60   : > { %s378_s26 = sshll.u32 %s606_s15, 7  ;;  %s246_s30 = scalar_lea.sflag [#allocation4], %s802_s18 }
  0x61   : > { %s818_s27 = scalar_lea.hbm %s868_s3, %s378_s26  ;;  %s524_s7 = scalar_lea.vmem %s813_s25, 128 }
  0x62   : > { %p525_p1 = scmp.ne.s32.totalorder %s813_s25, %s524_s7  ;;  %s619_s15 = smov [#allocation9]  }
  0x63   : > { %s528_s8 = sshll.u32 %s619_s15, 4  ;;  %s529_s8 = int_to_ptr.vmem [resolvable:$false] %s528_s8 }
  0x64   : > { %v231_v1 = vstv %s228_s19  ;;  %p526_p4 = pnand %p525_p1, %p745_p8  ;;  %s530_s9 = scalar_lea.vmem %s529_s8, 256 }
  0x65   : > { %v232_v2 = vmul.f32 %v231_v1, %v230_v0  ;;  %v242_v10 = vstv %s229_s20  ;;  %p531_p9 = scmp.lt.s32.totalorder %s813_s25, %s529_s8  ;;  %p532_p0 = scmp.lt.s32.totalorder %s530_s9, %s524_s7 }
  0x66   : > { %p527_p6 = pneg %p526_p4 }
  0x67   : > { %v233_v3 = vadd.f32 1.0, %v232_v2  ;;  %v236_v4 = vmul.f32 -0.5, %v232_v2  ;;  %v239_v6 = vand.u32 2147483647, %v232_v2  ;;  %p533_p11 = por %p532_p0, %p531_p9 }
  0x69   : > { %464 = vlog2.f32 %v233_v3  ;;  %v237_v5 = vadd.f32 1.0, %v236_v4  ;;  %vm240_vm0 = vcmp.lt.f32.partialorder %v239_v6, 0.0004427343  ;;  %p534_p5 = pnand %p533_p11, %p527_p6 }
  0x6b   : > { %v238_v7 = vmul.f32 %v237_v5, %v232_v2 }
  0x73   : > { %v465_v8 = vpop.eup %464 }
  0x74   : > { %v235_v9 = vmul.f32 0.6931472, %v465_v8 }
  0x76   : > { %v241_v11 = vsel %vm240_vm0, %v238_v7, %v235_v9 }
  0x77   : > { %v243_v12 = vmul.f32 %v242_v10, %v241_v11 }
  0x79   : > { %244 = vst [vmem:[%s227_s22] sm:$0xff] %v243_v12 }
  0x7a   : > { %537 = shalt.err (!%p534_p5)
}
  0x7b   : > { %s538_s21 = scalar_lea.hbm %s818_s27, 128  ;;  %s542_s10 = scalar_lea.hbm %s868_s3, 256 }
  0x7c   : > { %p539_p10 = scmp.ne.s32.totalorder %s818_s27, %s538_s21  ;;  %p543_p7 = scmp.lt.u32.totalorder %s818_s27, %s868_s3 }
  0x7d   : > { %p544_p12 = scmp.lt.u32.totalorder %s542_s10, %s538_s21  ;;  %p546_p1 = scmp.lt.u32.totalorder %s538_s21, %s818_s27 }
  0x7e   : > { %p540_p13 = pnand %p539_p10, %p745_p8 }
  0x7f   : > { %p545_p2 = por %p544_p12, %p543_p7 }
  0x80   : > { %p541_p3 = pneg %p540_p13 }
  0x81   : > { %p547_p4 = por %p546_p1, %p545_p2 }
  0x83   : > { %p548_p6 = pnand %p547_p4, %p541_p3 }
  0x85   : > { %551 = shalt.err (!%p548_p6)
}
  0x86   : > { %391 = dma.vmem_to_hbm [thread:$0]  (%p745_p8), %s813_s25, 128, %s818_s27, %s246_s30  }
  0x87 PF: > { %s272_s20 = sand.u32 1, %s594_s12   ;;  %p885_p9 = scmp.ne.s32.totalorder %s876_s23, 0 }
  0x88   : > { %p886_p0 = scmp.ge.s32.totalorder %s614_s17, 2  ;;  %s273_s22 = scalar_lea.sflag [#allocation4], %s272_s20 }
  0x8a   : > { %p405_p11 = pnand %p886_p0, %p885_p9 }
  0x8c   : > { %589 = dma.done.wait (!%p405_p11), %s273_s22, 128  }
  0x8d   : > { %591 = vsyncadd (!%p405_p11), %s273_s22, 4294967168  ;;  %s21_s17 = sadd.s32 1, %s614_s17   ;;  %s887_s12 = smov %s598_s13 }
  0x8e   : > { %p18_p5 = scmp.ge.s32.totalorder %s21_s17, 4   ;;  %s888_s13 = smov %s602_s14 }
  0x8f   : > { %s889_s14 = smov %s751_s6  ;;  %s890_s15 = smov %s610_s16 }
  0x90   : > { %s891_s16 = smov %s893_s29  ;;  %20 = sbr.rel (!%p18_p5) target bundleno = 8 (0x8), region = 87 }
  0x97   :  { %278 = vsyncpa [#allocation3], 1 }
  0x98   :  { %280 = vsyncpa [#allocation3 + $0x1], 1 }
  0x99   :  { %281 = vsyncpa [#allocation4], 1 }
  0x9a   :  { %283 = vsyncpa [#allocation4 + $0x1], 1 }
  0x9b   :  { %284 = vsyncpa [#allocation5], 1 }
  0x9c   :  { %286 = vsyncpa [#allocation5 + $0x1], 1 }
  0x9d   :  { %287 = vsyncpa [#allocation6], 1 }
  0x9e   :  { %289 = vsyncpa [#allocation6 + $0x1], 1 }

</bundles_post_ra>
